<compile_context>
chip_gen: v7x
topology: tpu7x:2x2x1
jax: 0.10.0
libtpu: 0.0.40
codegen_flags: <defaults>
</compile_context>

<pallas_src>
import functools
import math

import jax
import jax.numpy as jnp
from jax.experimental import pallas as pl
from jax.experimental.pallas import tpu as pltpu

LOG_2PI = math.log(2.0 * math.pi)
P = 128  # packed-output lane width (one full vreg lane span)


def _round_up(n: int, m: int) -> int:
    return ((n + m - 1) // m) * m


def _cdiv(a: int, b: int) -> int:
    return (a + b - 1) // b


# ----------------------------- Pallas kernel -------------------------------

def actor_critic_kernel(
    x_ref,    # [TB, D_in]  f32   activations (cast to weight dtype in-kernel)
    w1_ref,   # [D_in, H1p]       resident
    b1_ref,   # [1, H1p]    f32
    w2_ref,   # [H1p, H2p]        resident
    b2_ref,   # [1, H2p]    f32
    wh_ref,   # [H2p, 128]        fused heads: cols [0,A)=actor, col A=critic
    bh_ref,   # [1, 128]    f32
    out_ref,  # [TB, 128]   f32/bf16  packed: mean | value
    *,
    value_lane: int,
):
    """One batch tile of the fused MLP forward.

    Emits a lane-dense [TB, 128] slab: lanes [0, A) hold tanh(actor logits)
    (the policy mean); lane `value_lane` (== A) holds the raw critic value.
    The distribution math (sampling / log_prob / entropy) lives in the
    wrapper: it depends only on eps and logit_std, so keeping it out of the
    kernel removes the eps HBM stream and two masked bands entirely.
    Padded lanes carry finite garbage that the wrapper slices away.
    """
    x = x_ref[...]

    # linear1 + relu (f32 accumulation on the MXU)
    h1 = jnp.dot(x.astype(w1_ref.dtype), w1_ref[...],
                 preferred_element_type=jnp.float32) + b1_ref[...]
    h1 = jnp.maximum(h1, 0.0)

    # linear2 + relu
    h2 = jnp.dot(h1.astype(w2_ref.dtype), w2_ref[...],
                 preferred_element_type=jnp.float32) + b2_ref[...]
    h2 = jnp.maximum(h2, 0.0)

    # fused actor|critic head: one matmul
    heads = jnp.dot(h2.astype(wh_ref.dtype), wh_ref[...],
                    preferred_element_type=jnp.float32) + bh_ref[...]

    lane = jax.lax.broadcasted_iota(jnp.int32, heads.shape, 1)
    # tanh on actor lanes (EUP), raw linear on the critic lane.
    out_ref[...] = jnp.where(lane == value_lane, heads,
                             jnp.tanh(heads)).astype(out_ref.dtype)


# --------------------------- One-time param prep -----------------------------

def prepare_params(params, *, use_bf16: bool = False):
    """One-time parameter padding / fusion (do NOT call per forward step).

    - Pads hidden dims to multiples of 128 so every kernel matmul is unmasked.
    - Fuses actor_mean and critic into a single [H2p, 128] head (critic column
      at lane A).
    - Precomputes std = softplus(logit_std)+1e-5 and log(std) (batch-invariant).
    - Optionally casts matmul weights to bf16 (biases stay f32; v5e has no
      bf16 VPU/EUP, so all elementwise math stays f32 in-kernel).
    """
    A = params["logit_std"].shape[-1]
    if A + 1 > P:
        # TODO(synk): widen the packed slab to round_up(A+1, 128) for n_actions > 127.
        raise ValueError("n_actions too large for single-vreg packed output")

    d_in = params["w1"].shape[0]
    H1 = params["b1"].shape[-1]
    H2 = params["b2"].shape[-1]
    H1p = _round_up(H1, 128)
    H2p = _round_up(H2, 128)
    wdt = jnp.bfloat16 if use_bf16 else jnp.float32

    w1p = jnp.zeros((d_in, H1p), jnp.float32).at[:, :H1].set(
        params["w1"]).astype(wdt)
    b1p = jnp.zeros((1, H1p), jnp.float32).at[:, :H1].set(params["b1"])
    w2p = jnp.zeros((H1p, H2p), jnp.float32).at[:H1, :H2].set(
        params["w2"]).astype(wdt)
    b2p = jnp.zeros((1, H2p), jnp.float32).at[:, :H2].set(params["b2"])
    whp = (jnp.zeros((H2p, P), jnp.float32)
           .at[:H2, :A].set(params["wa"])
           .at[:H2, A].set(params["wc"][:, 0])
           .astype(wdt))
    bhp = (jnp.zeros((1, P), jnp.float32)
           .at[:, :A].set(params["ba"])
           .at[:, A].set(params["bc"][:, 0]))

    logit_std = params["logit_std"].reshape(1, A).astype(jnp.float32)
    std = jax.nn.softplus(logit_std) + 1e-5
    log_std = jnp.log(std)

    return {"w1p": w1p, "b1p": b1p, "w2p": w2p, "b2p": b2p,
            "whp": whp, "bhp": bhp, "std": std, "log_std": log_std}


# ------------------------------- Forward ------------------------------------

def actor_critic_forward(prepped, x, eps, *, tile_b: int = 1024,
                         out_bf16: bool = False):
    """Fused forward pass. x: [B, n_inputs], eps: [B, n_actions] ~ N(0,1).

    Returns (action, log_prob, entropy, value) with shapes
    [B,A], [B,A], [B,A], [B,1] — matching the PyTorch module's forward().
    """
    x = jnp.asarray(x, jnp.float32)
    eps = jnp.asarray(eps, jnp.float32)
    B, d_in = x.shape
    A = prepped["std"].shape[-1]

    w1p, b1p = prepped["w1p"], prepped["b1p"]
    w2p, b2p = prepped["w2p"], prepped["b2p"]
    whp, bhp = prepped["whp"], prepped["bhp"]
    H1p, H2p = w1p.shape[1], w2p.shape[1]

    # ---- batch tiling: big tiles to amortize the ~0.35us per-step overhead,
    # and >= 2 grid steps whenever possible so v7x's two TCs both get work.
    bf16_anywhere = (w1p.dtype == jnp.bfloat16) or out_bf16
    mult = 16 if bf16_anywhere else 8
    tb = min(_round_up(tile_b, mult), _round_up(B, mult))
    b_pad = _round_up(B, tb)
    if b_pad // tb == 1 and B > mult:
        tb = _round_up(_cdiv(B, 2), mult)
        b_pad = _round_up(B, tb)
    grid = (b_pad // tb,)

    xp = x if b_pad == B else jnp.pad(x, ((0, b_pad - B), (0, 0)))

    out_dtype = jnp.bfloat16 if out_bf16 else jnp.float32

    def resident(arr):
        # Weights stay resident in VMEM across the whole grid (constant index_map).
        # TODO(synk): for fc sizes >~1.5K on v7x, add pipeline_mode=pl.Buffered(1)
        # (or bf16 weights / vmem_limit_bytes) to halve resident-weight VMEM.
        return pl.BlockSpec(arr.shape, lambda i: (0, 0))

    kernel = functools.partial(actor_critic_kernel, value_lane=A)

    flops = 2 * b_pad * (d_in * H1p + H1p * H2p + H2p * P)
    bytes_accessed = (
        xp.size * xp.dtype.itemsize
        + b_pad * P * jnp.dtype(out_dtype).itemsize
        + sum(t.size * t.dtype.itemsize for t in (w1p, b1p, w2p, b2p, whp, bhp)))

    packed = pl.pallas_call(
        kernel,
        out_shape=jax.ShapeDtypeStruct((b_pad, P), out_dtype),
        grid=grid,
        in_specs=[
            pl.BlockSpec((tb, d_in), lambda i: (i, 0)),   # x tile
            resident(w1p), resident(b1p),
            resident(w2p), resident(b2p),
            resident(whp), resident(bhp),
        ],
        out_specs=pl.BlockSpec((tb, P), lambda i: (i, 0)),
        compiler_params=pltpu.CompilerParams(
            dimension_semantics=("parallel",)),
        cost_estimate=pl.CostEstimate(
            flops=flops,
            transcendentals=b_pad * P,
            bytes_accessed=bytes_accessed),
    )(xp, w1p, b1p, w2p, b2p, whp, bhp)

    mean = packed[:B, :A].astype(jnp.float32)
    value = packed[:B, A:A + 1].astype(jnp.float32)

    # Distribution math depends only on eps / logit_std — trivial XLA
    # elementwise that fuses with the eps producer and the slicing above.
    #   action   = mean + std*eps
    #   log_prob = -0.5*eps^2 - log_std - 0.5*log(2*pi)   (exact: (action-mean)/std == eps)
    #   entropy  = 0.5 + 0.5*log(2*pi) + log_std           (batch-invariant)
    std, log_std = prepped["std"], prepped["log_std"]
    action = mean + std * eps
    log_prob = -0.5 * eps * eps - log_std - 0.5 * LOG_2PI
    entropy = jnp.broadcast_to((0.5 + 0.5 * LOG_2PI) + log_std, (B, A))
    # TODO(synk): if a downstream Pallas/XLA PPO-loss kernel consumes these,
    # return `packed` (plus std/log_std) directly and slice in the consumer.
    return action, log_prob, entropy, value


# --------------------------- Parameter creation ------------------------------

def init_params(key, n_inputs, fc1_units, fc2_units, n_actions):
    """Deterministic init mirroring the PyTorch module's reset_parameters().

    Note: hidden_init() in the reference uses weight.size()[0] == out_features
    as "fan_in"; we reproduce that exactly.  Linear weights are stored
    pre-transposed as [in_features, out_features].
    """
    ks = jax.random.split(key, 8)

    def uniform(k, shape, lim):
        return jax.random.uniform(k, shape, jnp.float32, -lim, lim)

    lim1 = 1.0 / math.sqrt(fc1_units)             # hidden_init uses out dim
    w1 = uniform(ks[0], (n_inputs, fc1_units), lim1)
    b1 = uniform(ks[1], (1, fc1_units), 1.0 / math.sqrt(n_inputs))

    lim2 = 1.0 / math.sqrt(fc2_units)
    w2 = uniform(ks[2], (fc1_units, fc2_units), lim2)
    b2 = uniform(ks[3], (1, fc2_units), 1.0 / math.sqrt(fc1_units))

    lim_a = 1.0 / math.sqrt(fc2_units)            # default nn.Linear init
    wa = uniform(ks[4], (fc2_units, n_actions), lim_a)
    ba = uniform(ks[5], (1, n_actions), lim_a)
    wc = uniform(ks[6], (fc2_units, 1), lim_a)
    bc = uniform(ks[7], (1, 1), lim_a)

    logit_std = jnp.zeros((1, n_actions), jnp.float32)

    return {"w1": w1, "b1": b1, "w2": w2, "b2": b2,
            "wa": wa, "ba": ba, "wc": wc, "bc": bc, "logit_std": logit_std}


# ----------------------------- Pure-JAX reference ----------------------------

def reference_forward(params, x, eps):
    h1 = jnp.maximum(x @ params["w1"] + params["b1"], 0.0)
    h2 = jnp.maximum(h1 @ params["w2"] + params["b2"], 0.0)
    mean = jnp.tanh(h2 @ params["wa"] + params["ba"])
    v = h2 @ params["wc"] + params["bc"]
    std = jax.nn.softplus(params["logit_std"]) + 1e-5
    action = mean + std * eps
    log_prob = (-((action - mean) ** 2) / (2.0 * std * std)
                - jnp.log(std) - 0.5 * LOG_2PI)
    entropy = (0.5 + 0.5 * LOG_2PI) + jnp.log(std) + jnp.zeros_like(mean)
    return action, log_prob, entropy, v


# ---------------------------------- Main -------------------------------------

if __name__ == "__main__":
    B = 80            # not a multiple of the tile; exercises padding + 2-step grid
    N_INPUTS = 32
    FC1 = 64
    FC2 = 64
    N_ACTIONS = 8

    key = jax.random.PRNGKey(0)
    k_params, k_x, k_eps = jax.random.split(key, 3)

    params = init_params(k_params, N_INPUTS, FC1, FC2, N_ACTIONS)
    x = jax.random.normal(k_x, (B, N_INPUTS), jnp.float32)
    eps = jax.random.normal(k_eps, (B, N_ACTIONS), jnp.float32)

    ref_a, ref_lp, ref_ent, ref_v = reference_forward(params, x, eps)

    # ---------------- f32 path (strict parity) ----------------
    prepped32 = prepare_params(params, use_bf16=False)     # one-time
    fwd32 = jax.jit(functools.partial(actor_critic_forward,
                                      tile_b=1024, out_bf16=False))
    action, log_prob, entropy, value = jax.block_until_ready(
        fwd32(prepped32, x, eps))

    assert action.shape == (B, N_ACTIONS)
    assert log_prob.shape == (B, N_ACTIONS)
    assert entropy.shape == (B, N_ACTIONS)
    assert value.shape == (B, 1)
    for t in (action, log_prob, entropy, value):
        assert bool(jnp.all(jnp.isfinite(t)))

    assert bool(jnp.allclose(action, ref_a, atol=2e-2, rtol=2e-2))
    assert bool(jnp.allclose(log_prob, ref_lp, atol=2e-2, rtol=2e-2))
    assert bool(jnp.allclose(entropy, ref_ent, atol=1e-4, rtol=1e-4))
    assert bool(jnp.allclose(value, ref_v, atol=2e-2, rtol=2e-2))

    # ------- bf16 MXU operands + bf16 packed output (loose parity) -------
    prepped16 = prepare_params(params, use_bf16=True)       # one-time
    fwd16 = jax.jit(functools.partial(actor_critic_forward,
                                      tile_b=1024, out_bf16=True))
    a16, lp16, ent16, v16 = jax.block_until_ready(fwd16(prepped16, x, eps))
    for t in (a16, lp16, ent16, v16):
        assert bool(jnp.all(jnp.isfinite(t)))
    assert bool(jnp.allclose(a16, ref_a, atol=1e-1, rtol=1e-1))
    assert bool(jnp.allclose(v16, ref_v, atol=1e-1, rtol=1e-1))
    assert bool(jnp.allclose(lp16, ref_lp, atol=2e-2, rtol=2e-2))
    assert bool(jnp.allclose(ent16, ref_ent, atol=1e-4, rtol=1e-4))

    print("KERNEL_OK")
</pallas_src>

<mosaic_0001>
module attributes {stable_mosaic.version = 11 : i64} {
  func.func @actor_critic_kernel(%arg0: i32, %arg1: memref<40x32xf32, #tpu.memory_space<vmem>>, %arg2: memref<32x128xf32, #tpu.memory_space<vmem>>, %arg3: memref<1x128xf32, #tpu.memory_space<vmem>>, %arg4: memref<128x128xf32, #tpu.memory_space<vmem>>, %arg5: memref<1x128xf32, #tpu.memory_space<vmem>>, %arg6: memref<128x128xf32, #tpu.memory_space<vmem>>, %arg7: memref<1x128xf32, #tpu.memory_space<vmem>>, %arg8: memref<40x128xf32, #tpu.memory_space<vmem>>) attributes {dimension_semantics = [#tpu.dimension_semantics<parallel>], iteration_bounds = array<i64: 2>, scalar_prefetch = 0 : i64, scratch_operands = 0 : i64, tpu.core_type = #tpu.core_type<tc>, window_params = [{transform_indices = @transform_0, window_bounds = array<i64: 40, 32>}, {pipeline_mode = #tpu.pipeline_mode<synchronous>, transform_indices = @transform_1, window_bounds = array<i64: 32, 128>}, {pipeline_mode = #tpu.pipeline_mode<synchronous>, transform_indices = @transform_2, window_bounds = array<i64: 1, 128>}, {pipeline_mode = #tpu.pipeline_mode<synchronous>, transform_indices = @transform_3, window_bounds = array<i64: 128, 128>}, {pipeline_mode = #tpu.pipeline_mode<synchronous>, transform_indices = @transform_4, window_bounds = array<i64: 1, 128>}, {pipeline_mode = #tpu.pipeline_mode<synchronous>, transform_indices = @transform_5, window_bounds = array<i64: 128, 128>}, {pipeline_mode = #tpu.pipeline_mode<synchronous>, transform_indices = @transform_6, window_bounds = array<i64: 1, 128>}, {transform_indices = @transform_7, window_bounds = array<i64: 40, 128>}]} {
    %c0 = arith.constant 0 : index
    %c0_0 = arith.constant 0 : index
    %0 = vector.load %arg1[%c0, %c0_0] : memref<40x32xf32, #tpu.memory_space<vmem>>, vector<40x32xf32>
    %c0_1 = arith.constant 0 : index
    %c0_2 = arith.constant 0 : index
    %1 = vector.load %arg2[%c0_1, %c0_2] : memref<32x128xf32, #tpu.memory_space<vmem>>, vector<32x128xf32>
    %cst = arith.constant dense<0.000000e+00> : vector<40x128xf32>
    %2 = tpu.matmul %0, %1, %cst {dimension_numbers = #tpu.dot_dimension_numbers<[1], [0], [0], [1], [0, 0, 1, 1], [], []>} : vector<40x32xf32>, vector<32x128xf32>, vector<40x128xf32> -> vector<40x128xf32>
    %c0_3 = arith.constant 0 : index
    %c0_4 = arith.constant 0 : index
    %3 = vector.load %arg3[%c0_3, %c0_4] : memref<1x128xf32, #tpu.memory_space<vmem>>, vector<1x128xf32>
    %4 = vector.broadcast %3 : vector<1x128xf32> to vector<40x128xf32>
    %5 = arith.addf %2, %4 : vector<40x128xf32>
    %cst_5 = arith.constant 0.000000e+00 : f32
    %6 = vector.broadcast %cst_5 : f32 to vector<40x128xf32>
    %7 = arith.maximumf %5, %6 : vector<40x128xf32>
    %c0_6 = arith.constant 0 : index
    %c0_7 = arith.constant 0 : index
    %8 = vector.load %arg4[%c0_6, %c0_7] : memref<128x128xf32, #tpu.memory_space<vmem>>, vector<128x128xf32>
    %cst_8 = arith.constant dense<0.000000e+00> : vector<40x128xf32>
    %9 = tpu.matmul %7, %8, %cst_8 {dimension_numbers = #tpu.dot_dimension_numbers<[1], [0], [0], [1], [0, 0, 1, 1], [], []>} : vector<40x128xf32>, vector<128x128xf32>, vector<40x128xf32> -> vector<40x128xf32>
    %c0_9 = arith.constant 0 : index
    %c0_10 = arith.constant 0 : index
    %10 = vector.load %arg5[%c0_9, %c0_10] : memref<1x128xf32, #tpu.memory_space<vmem>>, vector<1x128xf32>
    %11 = vector.broadcast %10 : vector<1x128xf32> to vector<40x128xf32>
    %12 = arith.addf %9, %11 : vector<40x128xf32>
    %cst_11 = arith.constant 0.000000e+00 : f32
    %13 = vector.broadcast %cst_11 : f32 to vector<40x128xf32>
    %14 = arith.maximumf %12, %13 : vector<40x128xf32>
    %c0_12 = arith.constant 0 : index
    %c0_13 = arith.constant 0 : index
    %15 = vector.load %arg6[%c0_12, %c0_13] : memref<128x128xf32, #tpu.memory_space<vmem>>, vector<128x128xf32>
    %cst_14 = arith.constant dense<0.000000e+00> : vector<40x128xf32>
    %16 = tpu.matmul %14, %15, %cst_14 {dimension_numbers = #tpu.dot_dimension_numbers<[1], [0], [0], [1], [0, 0, 1, 1], [], []>} : vector<40x128xf32>, vector<128x128xf32>, vector<40x128xf32> -> vector<40x128xf32>
    %c0_15 = arith.constant 0 : index
    %c0_16 = arith.constant 0 : index
    %17 = vector.load %arg7[%c0_15, %c0_16] : memref<1x128xf32, #tpu.memory_space<vmem>>, vector<1x128xf32>
    %18 = vector.broadcast %17 : vector<1x128xf32> to vector<40x128xf32>
    %19 = arith.addf %16, %18 : vector<40x128xf32>
    %20 = tpu.iota {dimensions = array<i32: 1>} : vector<40x128xi32>
    %c8_i32 = arith.constant 8 : i32
    %21 = vector.broadcast %c8_i32 : i32 to vector<40x128xi32>
    %22 = arith.cmpi eq, %20, %21 : vector<40x128xi32>
    %23 = math.tanh %19 : vector<40x128xf32>
    %24 = arith.select %22, %19, %23 : vector<40x128xi1>, vector<40x128xf32>
    %c0_17 = arith.constant 0 : index
    %c0_18 = arith.constant 0 : index
    %25 = vector.load %arg8[%c0_17, %c0_18] : memref<40x128xf32, #tpu.memory_space<vmem>>, vector<40x128xf32>
    tpu.vector_store %arg8[%c0_17, %c0_18], %24 {strides = array<i32>} : memref<40x128xf32, #tpu.memory_space<vmem>>, vector<40x128xf32>,
    return
  }
  func.func @transform_0(%arg0: i32) -> (i32, i32) {
    %c0_i32 = arith.constant 0 : i32
    %c0_i32_0 = arith.constant 0 : i32
    return %arg0, %c0_i32 : i32, i32
  }
  func.func @transform_1(%arg0: i32) -> (i32, i32) {
    %c0_i32 = arith.constant 0 : i32
    %c0_i32_0 = arith.constant 0 : i32
    %c0_i32_1 = arith.constant 0 : i32
    return %c0_i32, %c0_i32_0 : i32, i32
  }
  func.func @transform_2(%arg0: i32) -> (i32, i32) {
    %c0_i32 = arith.constant 0 : i32
    %c0_i32_0 = arith.constant 0 : i32
    %c0_i32_1 = arith.constant 0 : i32
    return %c0_i32, %c0_i32_0 : i32, i32
  }
  func.func @transform_3(%arg0: i32) -> (i32, i32) {
    %c0_i32 = arith.constant 0 : i32
    %c0_i32_0 = arith.constant 0 : i32
    %c0_i32_1 = arith.constant 0 : i32
    return %c0_i32, %c0_i32_0 : i32, i32
  }
  func.func @transform_4(%arg0: i32) -> (i32, i32) {
    %c0_i32 = arith.constant 0 : i32
    %c0_i32_0 = arith.constant 0 : i32
    %c0_i32_1 = arith.constant 0 : i32
    return %c0_i32, %c0_i32_0 : i32, i32
  }
  func.func @transform_5(%arg0: i32) -> (i32, i32) {
    %c0_i32 = arith.constant 0 : i32
    %c0_i32_0 = arith.constant 0 : i32
    %c0_i32_1 = arith.constant 0 : i32
    return %c0_i32, %c0_i32_0 : i32, i32
  }
  func.func @transform_6(%arg0: i32) -> (i32, i32) {
    %c0_i32 = arith.constant 0 : i32
    %c0_i32_0 = arith.constant 0 : i32
    %c0_i32_1 = arith.constant 0 : i32
    return %c0_i32, %c0_i32_0 : i32, i32
  }
  func.func @transform_7(%arg0: i32) -> (i32, i32) {
    %c0_i32 = arith.constant 0 : i32
    %c0_i32_0 = arith.constant 0 : i32
    return %arg0, %c0_i32 : i32, i32
  }
}

</mosaic_0001>

<bundles_post_ra>
// kernel: actor_critic_forward.1
= control target key start
LH: loop header
LB: loop body
LE: loop exit
PB: predicated region body
PF: predicated region fallthrough
CT: control target
= control target key end

     0   :  { %12 = vsyncpa [#allocation3], 0  ;;  %s1361_s0 = inlined_call_operand.vmem [shape: f32[80,32], index: 0, kind: input, shape index: {}]   ;;  %s1362_s1 = inlined_call_operand.vmem [shape: f32[32,128], index: 1, kind: input, shape index: {}]   ;;  %s1363_s2 = inlined_call_operand.vmem [shape: f32[1,128], index: 2, kind: input, shape index: {}]   ;;  %s1364_s3 = inlined_call_operand.hbm [shape: f32[128,128], index: 3, kind: input, shape index: {}]   ;;  %s1365_s4 = inlined_call_operand.vmem [shape: f32[1,128], index: 4, kind: input, shape index: {}]   ;;  %s1366_s5 = inlined_call_operand.hbm [shape: f32[128,128], index: 5, kind: input, shape index: {}]   ;;  %s1367_s6 = inlined_call_operand.vmem [shape: f32[1,128], index: 6, kind: input, shape index: {}]   ;;  %s1368_s7 = inlined_call_operand.vmem [shape: f32[80,128], index: 7, kind: output, shape index: {}]  }
   0x1   :  { %13 = vsyncpa [#allocation5], 0  ;;  %s1172_s24 = smov 0  }
   0x2 LB: > { %s766_s25 = sadd.s32 4294967295, %s1123_s24   ;;  %p768_p0 = scmp.ge.s32.totalorder %s1123_s24, 1  ;;  %s1123_s24 = sphi %s1172_s24, %s19_s24  }
   0x3   : > { %p202_p1 = scmp.lt.s32.totalorder %s1123_s24, 3  ;;  %s1125_s26 = smov [#allocation2]  }
   0x4   : > { %s220_s27 = sshll.u32 %s1125_s26, 4  ;;  %p1186_p3 = scmp.eq.s32.totalorder %s766_s25, 0  ;;  %s221_s27 = int_to_ptr.vmem [resolvable:$true] %s220_s27 }
   0x5   : > { %p1180_p2 = pnand %p768_p0, %p202_p1  ;;  %s1126_s30 = smov [#allocation4]  }
   0x6   : > { %s1373_s29 = scalar_select %p1186_p3, 1, 0 }
   0x7   : > { %s1372_s28 = scalar_select %p1180_p2, 1, 0 }
   0x8   : > { %p1017_p4 = pneg %p1180_p2  ;;  %s236_s8 = sshll.u32 %s1126_s30, 4  ;;  %s1198_s8 = int_to_ptr.vmem [resolvable:$true] %s236_s8 }
   0x9   : > { %s1053_s12 = scalar_lea.hbm %s1364_s3, 2048 }
   0xa   : > { %p1194_p5 = pnand %p1186_p3, %p1017_p4  ;;  %p1054_p6 = scmp.ne.s32.totalorder %s1364_s3, %s1053_s12 }
   0xb   : > { %p1060_p10 = scmp.lt.u32.totalorder %s1053_s12, %s1364_s3 }
   0xc   : > { %p1055_p7 = pneg %p1194_p5 }
   0xe   : > { %p1056_p8 = pnand %p1055_p7, %p1054_p6 }
  0x10   : > { %p1057_p9 = pneg %p1056_p8 }
  0x12   : > { %p1062_p11 = pnand %p1060_p10, %p1057_p9 }
  0x14   : > { %1065 = shalt.err (!%p1062_p11)
}
  0x15   : > { %s1066_s17 = scalar_lea.vmem %s221_s27, 2048  ;;  %p1074_p1 = scmp.lt.s32.totalorder %s221_s27, %s221_s27 }
  0x16   : > { %p1067_p12 = scmp.ne.s32.totalorder %s221_s27, %s1066_s17  ;;  %p1075_p4 = scmp.lt.s32.totalorder %s1066_s17, %s1066_s17 }
  0x18   : > { %p1069_p13 = pnand %p1067_p12, %p1055_p7  ;;  %p1076_p3 = por %p1075_p4, %p1074_p1 }
  0x1a   : > { %p1070_p0 = pneg %p1069_p13 }
  0x1c   : > { %p1077_p2 = pnand %p1076_p3, %p1070_p0 }
  0x1e   : > { %1080 = shalt.err (!%p1077_p2)
}
  0x1f   : > { %s1127_s18 = smov 128   ;;  %s1128_s19 = smov 8  }
  0x20   : > { %1020 = dma.hbm_to_vmem [thread:$0]  (!%p1194_p5), %s1364_s3, 2048, %s221_s27, [#allocation3], %s1127_s18, %s1127_s18, %s1128_s19  }
  0x21   : > { %s1081_s26 = scalar_lea.hbm %s1366_s5, 2048 }
  0x22   : > { %p1082_p6 = scmp.ne.s32.totalorder %s1366_s5, %s1081_s26  ;;  %p1088_p8 = scmp.lt.u32.totalorder %s1081_s26, %s1366_s5 }
  0x24   : > { %p1084_p2 = pnand %p1082_p6, %p1055_p7 }
  0x26   : > { %p1085_p3 = pneg %p1084_p2 }
  0x28   : > { %p1090_p9 = pnand %p1088_p8, %p1085_p3 }
  0x2a   : > { %1093 = shalt.err (!%p1090_p9)
}
  0x2b   : > { %s1094_s27 = scalar_lea.vmem %s1198_s8, 2048  ;;  %p1102_p13 = scmp.lt.s32.totalorder %s1198_s8, %s1198_s8 }
  0x2c   : > { %p1095_p10 = scmp.ne.s32.totalorder %s1198_s8, %s1094_s27  ;;  %p1103_p0 = scmp.lt.s32.totalorder %s1094_s27, %s1094_s27 }
  0x2e   : > { %p1097_p11 = pnand %p1095_p10, %p1055_p7  ;;  %p1104_p1 = por %p1103_p0, %p1102_p13 }
  0x30   : > { %p1098_p12 = pneg %p1097_p11 }
  0x32   : > { %p1105_p4 = pnand %p1104_p1, %p1098_p12 }
  0x34   : > { %1108 = shalt.err (!%p1105_p4)
}
  0x35   : > { %1023 = dma.hbm_to_vmem [thread:$0]  (!%p1194_p5), %s1366_s5, 2048, %s1198_s8, [#allocation5], %s1127_s18, %s1127_s18, %s1128_s19  }
  0x36   : > { %p1375_p6 = scmp.ne.s32.totalorder %s1372_s28, 0 }
  0x37   : > { %p1376_p2 = scmp.ne.s32.totalorder (!%p1375_p6), %s1373_s29, 0 }
  0x38   : > { %264 = sbr.rel (%p1375_p6) target bundleno = 752 (0x2f0), region = 48 }
  0x3f   : > { %1114 = dma.done.wait (%p1376_p2), [#allocation3], 2048  }
  0x40   : > { %1116 = vsyncadd (%p1376_p2), [#allocation3], 4294965248 }
  0x41   : > { %1118 = dma.done.wait (%p1376_p2), [#allocation5], 2048  }
  0x42   : > { %1120 = vsyncadd (%p1376_p2), [#allocation5], 4294965248  ;;  %s300_s9 = smul.u32 5, %s766_s25  ;;  %v1129_v0 = vmov 0.0|0.0   ;;  %vm1130_vm0 = vmmov 0   ;;  %v1131_v1 = vmov 0.0  }
  0x43   : > { %955 = vmatprep.subr.bf16.mxu0 %v1129_v0  ;;  %846 = vmatprep.mubr.msk.f32.mxu0 %vm1130_vm0, %v1131_v1  ;;  %v317_v2 = vld [vmem:[%s1362_s1] sm:$0xff]  ;;  %v318_v3 = vld [vmem:[%s1362_s1 + $0x8] sm:$0xff]  ;;  %v319_v4 = vld [vmem:[%s1362_s1 + $0x10] sm:$0xff]  ;;  %vm328_vm1 = vcmask 261120  }
  0x44   : > { %p301_p5 = scmp.lt.s32.totalorder %s300_s9, 9  ;;  %961 = vmatprep.subr.bf16.mxu1 %v1129_v0  ;;  %893 = vmatprep.mubr.msk.f32.mxu1 %vm1130_vm0, %v1131_v1  ;;  %v956_v5 = vpack.c.bf16 %v318_v3, %v317_v2  ;;  %v320_v6 = vld [vmem:[%s1362_s1 + $0x18] sm:$0xff]  ;;  %v439_v8 = vld [vmem:[#allocation2] sm:$0xff]  ;;  %v440_v9 = vld [vmem:[#allocation2 + $0x8] sm:$0xff] }
  0x45   : > { %v959_v7 = vpack.c.bf16 %v320_v6, %v319_v4  ;;  %v441_v10 = vld [vmem:[#allocation2 + $0x10] sm:$0xff]  ;;  %v962_v11 = vpack.c.bf16 %v440_v9, %v439_v8  ;;  %v442_v12 = vld [vmem:[#allocation2 + $0x18] sm:$0xff]  ;;  %v443_v15 = vld [vmem:[#allocation2 + $0x20] sm:$0xff] }
  0x46   : > { %s1378_s9 = smov (!%p301_p5, %s300_s9), 9  ;;  %957 = vmatpush3.bf16.msra.mxu0 %v956_v5  ;;  %v965_v13 = vpack.c.bf16 %v442_v12, %v441_v10  ;;  %v444_v16 = vld [vmem:[#allocation2 + $0x28] sm:$0xff]  ;;  %v445_v19 = vld [vmem:[#allocation2 + $0x30] sm:$0xff]  ;;  %v446_v20 = vld [vmem:[#allocation2 + $0x38] sm:$0xff] }
  0x47   : > { %s775_s19 = sshll.u32 %s1378_s9, 3  ;;  %958 = vmatprep.subr.bf16.mxu0 %v1129_v0  ;;  %963 = vmatpush3.bf16.msra.mxu1 %v962_v11  ;;  %v968_v17 = vpack.c.bf16 %v444_v16, %v443_v15  ;;  %v971_v21 = vpack.c.bf16 %v446_v20, %v445_v19  ;;  %v447_v23 = vld [vmem:[#allocation2 + $0x40] sm:$0xff]  ;;  %v448_v24 = vld [vmem:[#allocation2 + $0x48] sm:$0xff]  ;;  %v449_v27 = vld [vmem:[#allocation2 + $0x50] sm:$0xff] }
  0x48   : > { %s1286_s22 = scalar_lea.vmem %s1361_s0, %s775_s19  ;;  %964 = vmatprep.subr.bf16.mxu1 %v1129_v0  ;;  %v974_v25 = vpack.c.bf16 %v448_v24, %v447_v23  ;;  %v450_v28 = vld [vmem:[#allocation2 + $0x58] sm:$0xff]  ;;  %v451_v31 = vld [vmem:[#allocation2 + $0x60] sm:$0xff]  ;;  %v452_v32 = vld [vmem:[#allocation2 + $0x68] sm:$0xff]  ;;  %s310_s14 = scalar_lea.vmem %s1368_s7, %s775_s19 }
  0x49   : > { %v312_v14 = vld [vmem:[%s1286_s22] sm:$0xff]  ;;  %v313_v18 = vld [vmem:[%s1286_s22 + $0x8] sm:$0xff]  ;;  %v314_v22 = vld [vmem:[%s1286_s22 + $0x10] sm:$0xff]  ;;  %v977_v29 = vpack.c.bf16 %v450_v28, %v449_v27  ;;  %v980_v33 = vpack.c.bf16 %v452_v32, %v451_v31 }
  0x4a   : > { %960 = vmatpush3.bf16.msra.mxu0 %v959_v7  ;;  %v315_v26 = vld [vmem:[%s1286_s22 + $0x18] sm:$0xff]  ;;  %v316_v30 = vld [vmem:[%s1286_s22 + $0x20] sm:$0xff]  ;;  %v453_v34 = vld [vmem:[#allocation2 + $0x70] sm:$0xff] }
  0x4b   : > { %985 = vmatprep.subr.bf16.mxu0 %v1129_v0  ;;  %966 = vmatpush3.bf16.msra.mxu1 %v965_v13  ;;  %v454_v35 = vld [vmem:[#allocation2 + $0x78] sm:$0xff]  ;;  %v557_v37 = vld [vmem:[#allocation4] sm:$0xff]  ;;  %v558_v38 = vld [vmem:[#allocation4 + $0x8] sm:$0xff] }
  0x4c   : > { %967 = vmatprep.subr.bf16.mxu1 %v1129_v0  ;;  %v983_v36 = vpack.c.bf16 %v454_v35, %v453_v34  ;;  %v559_v39 = vld [vmem:[#allocation4 + $0x10] sm:$0xff]  ;;  %v986_v40 = vpack.c.bf16 %v558_v38, %v557_v37  ;;  %v560_v41 = vld [vmem:[#allocation4 + $0x18] sm:$0xff]  ;;  %v561_v43 = vld [vmem:[#allocation4 + $0x20] sm:$0xff] }
  0x4d   : > { %847 = vmatmul.mubr.msk.f32.vlgmr.msra.gmra.mrb[0].mxu0 %vm328_vm1, %v312_v14  ;;  %v989_v42 = vpack.c.bf16 %v560_v41, %v559_v39  ;;  %v562_v44 = vld [vmem:[#allocation4 + $0x28] sm:$0xff]  ;;  %v563_v46 = vld [vmem:[#allocation4 + $0x30] sm:$0xff]  ;;  %v564_v47 = vld [vmem:[#allocation4 + $0x38] sm:$0xff] }
  0x4e   : > { %849 = vmatprep.mubr.msk.f32.mxu0 %vm1130_vm0, %v1131_v1  ;;  %987 = vmatpush3.bf16.msra.mxu0 %v986_v40  ;;  %v992_v45 = vpack.c.bf16 %v562_v44, %v561_v43  ;;  %v995_v48 = vpack.c.bf16 %v564_v47, %v563_v46  ;;  %v565_v49 = vld [vmem:[#allocation4 + $0x40] sm:$0xff]  ;;  %v566_v50 = vld [vmem:[#allocation4 + $0x48] sm:$0xff]  ;;  %v567_v52 = vld [vmem:[#allocation4 + $0x50] sm:$0xff]  ;;  %v670_v44 = vlaneseq }
  0x4f   : > { %969 = vmatpush3.bf16.msra.mxu1 %v968_v17  ;;  %988 = vmatprep.subr.bf16.mxu0 %v1129_v0  ;;  %v998_v51 = vpack.c.bf16 %v566_v50, %v565_v49  ;;  %v568_v53 = vld [vmem:[#allocation4 + $0x58] sm:$0xff]  ;;  %v569_v55 = vld [vmem:[#allocation4 + $0x60] sm:$0xff]  ;;  %v570_v56 = vld [vmem:[#allocation4 + $0x68] sm:$0xff] }
  0x50   : > { %970 = vmatprep.subr.bf16.mxu1 %v1129_v0  ;;  %v1001_v54 = vpack.c.bf16 %v568_v53, %v567_v52  ;;  %v1004_v57 = vpack.c.bf16 %v570_v56, %v569_v55  ;;  %v777_v58 = vld [vmem:[%s1363_s2] ss:$0 sm:$0xff]  ;;  %v571_v16 = vld [vmem:[#allocation4 + $0x70] sm:$0xff]  ;;  %v572_v17 = vld [vmem:[#allocation4 + $0x78] sm:$0xff] }
  0x51   : > { %850 = vmatmul.mubr.msk.f32.gmra.mrb[2].mxu0 %vm328_vm1, %v313_v18  ;;  %v1007_v18 = vpack.c.bf16 %v572_v17, %v571_v16  ;;  %v783_v19 = vld [vmem:[%s1365_s4] ss:$0 sm:$0xff] }
  0x52   : > { %852 = vmatprep.mubr.msk.f32.mxu0 %vm1130_vm0, %v1131_v1  ;;  %990 = vmatpush3.bf16.msra.mxu0 %v989_v42  ;;  %v784_v40 = vld [vmem:[%s1367_s6] ss:$0 sm:$0xff] }
  0x53   : > { %972 = vmatpush3.bf16.msra.mxu1 %v971_v21  ;;  %991 = vmatprep.subr.bf16.mxu0 %v1129_v0 }
  0x54   : > { %973 = vmatprep.subr.bf16.mxu1 %v1129_v0 }
  0x55   : > { %853 = vmatmul.mubr.msk.f32.gmra.mrb[4].mxu0 %vm328_vm1, %v314_v22 }
  0x56   : > { %855 = vmatprep.mubr.msk.f32.mxu0 %vm1130_vm0, %v1131_v1  ;;  %993 = vmatpush3.bf16.msra.mxu0 %v992_v45 }
  0x57   : > { %975 = vmatpush3.bf16.msra.mxu1 %v974_v25  ;;  %994 = vmatprep.subr.bf16.mxu0 %v1129_v0 }
  0x58   : > { %976 = vmatprep.subr.bf16.mxu1 %v1129_v0 }
  0x59   : > { %856 = vmatmul.mubr.msk.f32.gmra.mrb[6].mxu0 %vm328_vm1, %v315_v26 }
  0x5a   : > { %858 = vmatprep.mubr.msk.f32.mxu0 %vm1130_vm0, %v1131_v1  ;;  %996 = vmatpush3.bf16.msra.mxu0 %v995_v48  ;;  %v671_v48 = vand.u32 127, %v670_v44 }
  0x5b   : > { %978 = vmatpush3.bf16.msra.mxu1 %v977_v29  ;;  %997 = vmatprep.subr.bf16.mxu0 %v1129_v0 }
  0x5c   : > { %979 = vmatprep.subr.bf16.mxu1 %v1129_v0  ;;  %vm672_vm2 = vcmp.eq.s32.totalorder %v671_v48, 8 }
  0x5d   : > { %859 = vmatmul.mubr.msk.f32.gmra.mrb[8].mxu0 %vm328_vm1, %v316_v30 }
  0x5e   : > { %940 = vmatprep.mubr.msk.f32.mxu0 %vm1130_vm0, %v1131_v1  ;;  %999 = vmatpush3.bf16.msra.mxu0 %v998_v51 }
  0x5f   : > { %981 = vmatpush3.bf16.msra.mxu1 %v980_v33  ;;  %1000 = vmatprep.subr.bf16.mxu0 %v1129_v0 }
  0x60   : > { %982 = vmatprep.subr.bf16.mxu1 %v1129_v0 }
  0x62   : > { %1002 = vmatpush3.bf16.msra.mxu0 %v1001_v54 }
  0x63   : > { %984 = vmatpush3.bf16.msra.mxu1 %v983_v36  ;;  %1003 = vmatprep.subr.bf16.mxu0 %v1129_v0 }
  0x66   : > { %1005 = vmatpush3.bf16.msra.mxu0 %v1004_v57 }
  0x67   : > { %1006 = vmatprep.subr.bf16.mxu0 %v1129_v0 }
  0x6a   : > { %1008 = vmatpush3.bf16.msra.mxu0 %v1007_v18 }
 0x120   : > { %v410_v59 = vpop.f32.mrb[0].mxu0 }
 0x121   : > { %v411_v60 = vadd.f32 %v777_v58, %v410_v59  ;;  %v848_v61 = vpop.f32.mrb[1].mxu0 }
 0x123   : > { %v434_v62 = vmax.f32 %v411_v60, 0.0 }
 0x124   : > { %v415_v63 = vpop.f32.mrb[2].mxu0 }
 0x125   : > { %v416_v2 = vadd.f32 %v777_v58, %v415_v63  ;;  %v851_v3 = vpop.f32.mrb[3].mxu0  ;;  %894 = vmatmul.mubr.f32.vlgmr.msra.gmra.mrb[0].mxu1 %v434_v62 }
 0x126   : > { %896 = vmatprep.mubr.msk.f32.mxu1 %vm1130_vm0, %v1131_v1 }
 0x127   : > { %v435_v4 = vmax.f32 %v416_v2, 0.0 }
 0x128   : > { %v420_v5 = vpop.f32.mrb[4].mxu0 }
 0x129   : > { %v421_v6 = vadd.f32 %v777_v58, %v420_v5  ;;  %v854_v7 = vpop.f32.mrb[5].mxu0  ;;  %897 = vmatmul.mubr.f32.gmra.mrb[2].mxu1 %v435_v4 }
 0x12a   : > { %899 = vmatprep.mubr.msk.f32.mxu1 %vm1130_vm0, %v1131_v1 }
 0x12b   : > { %v436_v0 = vmax.f32 %v421_v6, 0.0 }
 0x12c   : > { %v425_v8 = vpop.f32.mrb[6].mxu0 }
 0x12d   : > { %v426_v9 = vadd.f32 %v777_v58, %v425_v8  ;;  %v857_v10 = vpop.f32.mrb[7].mxu0  ;;  %900 = vmatmul.mubr.f32.gmra.mrb[4].mxu1 %v436_v0 }
 0x12e   : > { %902 = vmatprep.mubr.msk.f32.mxu1 %vm1130_vm0, %v1131_v1 }
 0x12f   : > { %v437_v11 = vmax.f32 %v426_v9, 0.0 }
 0x130   : > { %v430_v12 = vpop.f32.mrb[8].mxu0 }
 0x131   : > { %v431_v13 = vadd.f32 %v777_v58, %v430_v12  ;;  %v860_v14 = vpop.f32.mrb[9].mxu0  ;;  %903 = vmatmul.mubr.f32.gmra.mrb[6].mxu1 %v437_v11 }
 0x132   : > { %905 = vmatprep.mubr.msk.f32.mxu1 %vm1130_vm0, %v1131_v1 }
 0x133   : > { %v438_v15 = vmax.f32 %v431_v13, 0.0 }
 0x135   : > { %906 = vmatmul.mubr.f32.gmra.mrb[8].mxu1 %v438_v15 }
 0x1f8   : > { %v528_v20 = vpop.f32.mrb[0].mxu1 }
 0x1f9   : > { %v529_v21 = vadd.f32 %v783_v19, %v528_v20  ;;  %v895_v22 = vpop.f32.mrb[1].mxu1 }
 0x1fb   : > { %v552_v23 = vmax.f32 %v529_v21, 0.0 }
 0x1fc   : > { %v533_v24 = vpop.f32.mrb[2].mxu1 }
 0x1fd   : > { %v534_v25 = vadd.f32 %v783_v19, %v533_v24  ;;  %v898_v26 = vpop.f32.mrb[3].mxu1  ;;  %941 = vmatmul.mubr.f32.vlgmr.msra.gmra.mrb[10].mxu0 %v552_v23 }
 0x1fe   : > { %943 = vmatprep.mubr.msk.f32.mxu0 %vm1130_vm0, %v1131_v1 }
 0x1ff   : > { %v553_v27 = vmax.f32 %v534_v25, 0.0 }
 0x200   : > { %v538_v28 = vpop.f32.mrb[4].mxu1 }
 0x201   : > { %v539_v29 = vadd.f32 %v783_v19, %v538_v28  ;;  %v901_v30 = vpop.f32.mrb[5].mxu1  ;;  %944 = vmatmul.mubr.f32.gmra.mrb[12].mxu0 %v553_v27 }
 0x202   : > { %946 = vmatprep.mubr.msk.f32.mxu0 %vm1130_vm0, %v1131_v1 }
 0x203   : > { %v554_v31 = vmax.f32 %v539_v29, 0.0 }
 0x204   : > { %v543_v32 = vpop.f32.mrb[6].mxu1 }
 0x205   : > { %v544_v33 = vadd.f32 %v783_v19, %v543_v32  ;;  %v904_v34 = vpop.f32.mrb[7].mxu1  ;;  %947 = vmatmul.mubr.f32.gmra.mrb[14].mxu0 %v554_v31 }
 0x206   : > { %949 = vmatprep.mubr.msk.f32.mxu0 %vm1130_vm0, %v1131_v1 }
 0x207   : > { %v555_v35 = vmax.f32 %v544_v33, 0.0 }
 0x208   : > { %v548_v36 = vpop.f32.mrb[8].mxu1 }
 0x209   : > { %v549_v37 = vadd.f32 %v783_v19, %v548_v36  ;;  %v907_v38 = vpop.f32.mrb[9].mxu1  ;;  %950 = vmatmul.mubr.f32.gmra.mrb[16].mxu0 %v555_v35 }
 0x20a   : > { %952 = vmatprep.mubr.msk.f32.mxu0 %vm1130_vm0, %v1131_v1 }
 0x20b   : > { %v556_v39 = vmax.f32 %v549_v37, 0.0 }
 0x20d   : > { %953 = vmatmul.mubr.f32.gmra.mrb[18].mxu0 %v556_v39 }
 0x2d0   : > { %v646_v41 = vpop.f32.mrb[10].mxu0 }
 0x2d1   : > { %v647_v42 = vadd.f32 %v784_v40, %v646_v41  ;;  %v942_v43 = vpop.f32.mrb[11].mxu0 }
 0x2d3   : > { %1043 = vtanh.f32 %v647_v42 }
 0x2d4   : > { %v651_v45 = vpop.f32.mrb[12].mxu0 }
 0x2d5   : > { %v652_v46 = vadd.f32 %v784_v40, %v651_v45  ;;  %v945_v47 = vpop.f32.mrb[13].mxu0 }
 0x2d7   : > { %1045 = vtanh.f32 %v652_v46 }
 0x2d8   : > { %v656_v49 = vpop.f32.mrb[14].mxu0 }
 0x2d9   : > { %v657_v50 = vadd.f32 %v784_v40, %v656_v49  ;;  %v948_v1 = vpop.f32.mrb[15].mxu0 }
 0x2db   : > { %1047 = vtanh.f32 %v657_v50 }
 0x2dc   : > { %v661_v51 = vpop.f32.mrb[16].mxu0 }
 0x2dd   : > { %v1044_v52 = vpop.eup %1043  ;;  %v662_v53 = vadd.f32 %v784_v40, %v661_v51  ;;  %v951_v54 = vpop.f32.mrb[17].mxu0 }
 0x2de   : > { %v678_v55 = vsel %vm672_vm2, %v647_v42, %v1044_v52 }
 0x2df   : > { %683 = vst [vmem:[%s310_s14] sm:$0xff] %v678_v55  ;;  %1049 = vtanh.f32 %v662_v53 }
 0x2e0   : > { %v666_v56 = vpop.f32.mrb[18].mxu0 }
 0x2e1   : > { %v1046_v57 = vpop.eup %1045  ;;  %v667_v58 = vadd.f32 %v784_v40, %v666_v56  ;;  %v954_v59 = vpop.f32.mrb[19].mxu0 }
 0x2e2   : > { %v679_v60 = vsel %vm672_vm2, %v652_v46, %v1046_v57 }
 0x2e3   : > { %684 = vst [vmem:[%s310_s14 + $0x8] sm:$0xff] %v679_v60  ;;  %1051 = vtanh.f32 %v667_v58 }
 0x2e5   : > { %v1048_v61 = vpop.eup %1047 }
 0x2e6   : > { %v680_v62 = vsel %vm672_vm2, %v657_v50, %v1048_v61 }
 0x2e7   : > { %685 = vst [vmem:[%s310_s14 + $0x10] sm:$0xff] %v680_v62 }
 0x2e9   : > { %v1050_v63 = vpop.eup %1049 }
 0x2ea   : > { %v681_v2 = vsel %vm672_vm2, %v662_v53, %v1050_v63 }
 0x2eb   : > { %686 = vst [vmem:[%s310_s14 + $0x18] sm:$0xff] %v681_v2 }
 0x2ed   : > { %v1052_v3 = vpop.eup %1051 }
 0x2ee   : > { %v682_v4 = vsel %vm672_vm2, %v667_v58, %v1052_v3 }
 0x2ef   : > { %687 = vst [vmem:[%s310_s14 + $0x20] sm:$0xff] %v682_v4 }
 0x2f0 PF: > { %s19_s24 = sadd.s32 1, %s1123_s24  }
 0x2f1   : > { %p16_p7 = scmp.ge.s32.totalorder %s19_s24, 4  }
 0x2f3   :  { %18 = sbr.rel (!%p16_p7) target bundleno = 2 (0x2), region = 87 }
 0x2fa   :  { %710 = vsyncpa [#allocation3], 1 }
 0x2fb   :  { %712 = vsyncpa [#allocation3 + $0x1], 1 }
 0x2fc   :  { %713 = vsyncpa [#allocation5], 1 }

</bundles_post_ra>
